<compile_context>
chip_gen: v5e
topology: v5e:2x2
jax: 0.10.0
libtpu: 0.0.40
codegen_flags: <defaults>
</compile_context>

<pallas_src>
import functools

import jax
import jax.numpy as jnp
from jax.experimental import pallas as pl
from jax.experimental.pallas import tpu as pltpu


def _circular_pad_kernel(x_ref, o_ref, *, pad: int, w: int):
    """x_ref: (TR, W) in VMEM, o_ref: (TR, W + 2*pad) in VMEM."""
    x = x_ref[...]
    # Body copy: each output element written exactly once, no temporaries.
    o_ref[:, pad:pad + w] = x
    if pad > 0:
        o_ref[:, :pad] = x[:, w - pad:]      # left pad wraps from the right edge
        o_ref[:, w + pad:] = x[:, :pad]      # right pad wraps from the left edge


def _choose_row_tile(rows: int, w: int, out_w: int, itemsize: int) -> int:
    """Row tile: sublane-packed, byte-targeted, and >=2 balanced grid steps."""
    pack = max(8, 32 // itemsize)            # 8 (f32), 16 (bf16), 32 (i8/fp8)
    if rows <= 2 * pack:
        # Too few rows to split meaningfully across TCs; full-extent block.
        return rows

    # Target ~4 MiB combined (input + output) per grid step; with default
    # double-buffering the pipeline footprint is ~8 MiB, comfortably inside
    # the explicit 16 MiB vmem_limit_bytes and v5e's 16 MiB scoped default.
    target_tile_bytes = 4 * 1024 * 1024
    bytes_per_row = (w + out_w) * itemsize
    tr = (target_tile_bytes // bytes_per_row) // pack * pack
    tr = max(pack, tr)

    # Guarantee >=2 near-equal, pack-aligned grid steps so v7x's two
    # TensorCores both get work under dimension_semantics=("parallel",).
    n_steps = max(2, pl.cdiv(rows, tr))
    tr = pl.cdiv(pl.cdiv(rows, n_steps), pack) * pack
    return min(tr, rows)


def circular_padding(img: jax.Array, padding: int) -> jax.Array:
    """Equivalent of torch.nn.functional.pad(img, (padding, padding), 'circular')."""
    if padding < 0:
        raise ValueError("negative padding not supported for circular mode")
    if padding == 0:
        return img                           # fast path: no kernel, no HBM traffic

    *lead, w = img.shape
    if padding > w:
        # Matches PyTorch: circular padding may not exceed the dimension size.
        raise ValueError(f"circular padding ({padding}) > last-dim size ({w})")

    rows = 1
    for d in lead:
        rows *= d
    x2d = img.reshape(rows, w)
    out_w = w + 2 * padding

    itemsize = jnp.dtype(img.dtype).itemsize
    tr = _choose_row_tile(rows, w, out_w, itemsize)
    grid = (pl.cdiv(rows, tr),)

    # Pure data movement: roofline = (bytes_in + bytes_out) / HBM BW.
    bytes_accessed = rows * (w + out_w) * itemsize
    cost = pl.CostEstimate(flops=0, transcendentals=0,
                           bytes_accessed=bytes_accessed)

    out2d = pl.pallas_call(
        functools.partial(_circular_pad_kernel, pad=padding, w=w),
        out_shape=jax.ShapeDtypeStruct((rows, out_w), img.dtype),
        grid_spec=pltpu.PrefetchScalarGridSpec(
            num_scalar_prefetch=0,
            grid=grid,
            # Last dim is full-extent (W / out_w); row dim is either a
            # pack-multiple tile or the full extent -> (8,128) rule satisfied.
            in_specs=[pl.BlockSpec((tr, w), lambda i: (i, 0))],
            out_specs=pl.BlockSpec((tr, out_w), lambda i: (i, 0)),
        ),
        compiler_params=pltpu.CompilerParams(
            # Rows are independent -> shard grid steps across both TCs on v7x.
            dimension_semantics=("parallel",),
            # Explicit, generation-safe limit: ~8 MiB pipeline footprint fits
            # v5e's 16 MiB scoped default and v7x's 64 MiB physical VMEM.
            vmem_limit_bytes=16 * 1024 * 1024,
        ),
        cost_estimate=cost,
    )(x2d)

    return out2d.reshape(*lead, out_w)


if __name__ == "__main__":
    key = jax.random.PRNGKey(0)
    N, C, H, W = 2, 4, 16, 16
    pad = 2

    x = jax.random.normal(key, (N, C, H, W), dtype=jnp.float32)

    out = circular_padding(x, pad)
    out = jax.block_until_ready(out)

    # Reference: wrap-pad the last axis only (matches F.pad(..., (p, p), 'circular')).
    ref = jnp.pad(x, ((0, 0), (0, 0), (0, 0), (pad, pad)), mode="wrap")
    assert out.shape == (N, C, H, W + 2 * pad), out.shape
    assert jnp.allclose(out, ref), "mismatch vs reference circular pad"

    # pad == 0 fast path (no kernel launch).
    out0 = jax.block_until_ready(circular_padding(x, 0))
    assert jnp.allclose(out0, x)

    # Non-tile-aligned row count (rows = 15) exercises the masked last tile.
    y = jax.random.normal(key, (3, 5, 16), dtype=jnp.float32)
    ref_y = jnp.pad(y, ((0, 0), (0, 0), (pad, pad)), mode="wrap")
    out_y = jax.block_until_ready(circular_padding(y, pad))
    assert jnp.allclose(out_y, ref_y)

    # padding == W wraps exactly once.
    z = jax.random.normal(key, (2, 8, 8), dtype=jnp.float32)
    ref_z = jnp.pad(z, ((0, 0), (0, 0), (8, 8)), mode="wrap")
    out_z = jax.block_until_ready(circular_padding(z, 8))
    assert jnp.allclose(out_z, ref_z)

    print("KERNEL_OK")
</pallas_src>

<mosaic_0001>
module attributes {stable_mosaic.version = 11 : i64} {
  func.func @_circular_pad_kernel(%arg0: i32, %arg1: memref<64x16xf32, #tpu.memory_space<vmem>>, %arg2: memref<64x20xf32, #tpu.memory_space<vmem>>) attributes {dimension_semantics = [#tpu.dimension_semantics<parallel>], iteration_bounds = array<i64: 2>, scalar_prefetch = 0 : i64, scratch_operands = 0 : i64, tpu.core_type = #tpu.core_type<tc>, window_params = [{transform_indices = @transform_0, window_bounds = array<i64: 64, 16>}, {transform_indices = @transform_1, window_bounds = array<i64: 64, 20>}]} {
    %c0 = arith.constant 0 : index
    %c0_0 = arith.constant 0 : index
    %0 = vector.load %arg1[%c0, %c0_0] : memref<64x16xf32, #tpu.memory_space<vmem>>, vector<64x16xf32>
    %c0_1 = arith.constant 0 : index
    %c2 = arith.constant 2 : index
    %1 = vector.load %arg2[%c0_1, %c2] : memref<64x20xf32, #tpu.memory_space<vmem>>, vector<64x16xf32>
    tpu.vector_store %arg2[%c0_1, %c2], %0 {strides = array<i32>} : memref<64x20xf32, #tpu.memory_space<vmem>>, vector<64x16xf32>,
    %2 = vector.extract_strided_slice %0 {offsets = [0, 14], sizes = [64, 2], strides = [1, 1]} : vector<64x16xf32> to vector<64x2xf32>
    %c0_2 = arith.constant 0 : index
    %c0_3 = arith.constant 0 : index
    %3 = vector.load %arg2[%c0_2, %c0_3] : memref<64x20xf32, #tpu.memory_space<vmem>>, vector<64x2xf32>
    tpu.vector_store %arg2[%c0_2, %c0_3], %2 {strides = array<i32>} : memref<64x20xf32, #tpu.memory_space<vmem>>, vector<64x2xf32>,
    %4 = vector.extract_strided_slice %0 {offsets = [0, 0], sizes = [64, 2], strides = [1, 1]} : vector<64x16xf32> to vector<64x2xf32>
    %c0_4 = arith.constant 0 : index
    %c18 = arith.constant 18 : index
    %5 = vector.load %arg2[%c0_4, %c18] : memref<64x20xf32, #tpu.memory_space<vmem>>, vector<64x2xf32>
    tpu.vector_store %arg2[%c0_4, %c18], %4 {strides = array<i32>} : memref<64x20xf32, #tpu.memory_space<vmem>>, vector<64x2xf32>,
    return
  }
  func.func @transform_0(%arg0: i32) -> (i32, i32) {
    %c0_i32 = arith.constant 0 : i32
    %c0_i32_0 = arith.constant 0 : i32
    return %arg0, %c0_i32 : i32, i32
  }
  func.func @transform_1(%arg0: i32) -> (i32, i32) {
    %c0_i32 = arith.constant 0 : i32
    %c0_i32_0 = arith.constant 0 : i32
    return %arg0, %c0_i32 : i32, i32
  }
}

</mosaic_0001>

<bundles_post_ra>
// kernel: tpu_custom_call.1
= control target key start
LH: loop header
LB: loop body
LE: loop exit
PB: predicated region body
PF: predicated region fallthrough
CT: control target
= control target key end

     0   :  { %s334_s6 = smov 0   ;;  %s408_s0 = inlined_call_operand.vmem [shape: f32[128,16], index: 0, kind: input, shape index: {}]   ;;  %s409_s1 = inlined_call_operand.vmem [shape: f32[128,20], index: 1, kind: output, shape index: {}]  }
   0x1 LB: > { %s291_s7 = sadd.s32 4294967295, %s319_s6   ;;  %p295_p0 = scmp.ge.s32.totalorder %s319_s6, 1  ;;  %s319_s6 = sphi %s334_s6, %s11_s6  }
   0x2   : > { %p88_p1 = scmp.lt.s32.totalorder %s319_s6, 3 }
   0x4   : > { %p89_p2 = pnand %p295_p0, %p88_p1 }
   0x5   : > { %s296_s8 = sshll.u32 (!%p89_p2), %s291_s7, 3  ;;  %s321_s13 = smov (!%p89_p2), 2  }
   0x6   : > { %92 = sbr.rel (%p89_p2) target bundleno = 188 (0xbc), region = 24  ;;  %p109_p3 = scmp.lt.s32.totalorder (!%p89_p2), %s296_s8, 15 }
   0x7   : > { %s322_s14 = smov (!%p89_p2), 114   ;;  %s323_s15 = smov (!%p89_p2), 18  }
   0xb   : > { %s411_s8 = smov (!%p109_p3, %s296_s8), 15  ;;  %vm160_vm0 = vcmask 146448   ;;  %vm193_vm1 = vcmask 15360   ;;  %vm226_vm2 = vcmask 162960  }
   0xc   : > { %s297_s9 = sshll.u32 %s411_s8, 3 }
   0xd   : > { %s112_s12 = scalar_lea.vmem %s408_s0, %s297_s9  ;;  %s355_s18 = scalar_lea.vmem %s409_s1, %s297_s9 }
   0xe   : > { %v122_v0 = vld [vmem:[%s112_s12 + $0x10] sm:$0xff]  ;;  %v120_v1 = vld [vmem:[%s112_s12] sm:$0xff]  ;;  %v123_v3 = vld [vmem:[%s112_s12 + $0x18] sm:$0xff] }
   0xf   : > { %140 = vrot.lane.b32.xlu1 %v122_v0, %s321_s13  ;;  %136 = vrot.lane.b32.xlu0 %v120_v1, %s321_s13  ;;  %v124_v2 = vld [vmem:[%s112_s12 + $0x20] sm:$0xff]  ;;  %v121_v4 = vld [vmem:[%s112_s12 + $0x8] sm:$0xff] }
  0x10   : > { %144 = vrot.lane.b32.xlu2 %v124_v2, %s321_s13  ;;  %v125_v5 = vld [vmem:[%s112_s12 + $0x28] sm:$0xff]  ;;  %v127_v6 = vld [vmem:[%s112_s12 + $0x38] sm:$0xff]  ;;  %v126_v7 = vld [vmem:[%s112_s12 + $0x30] sm:$0xff] }
  0x17   : > { %142 = vrot.lane.b32.xlu1 %v123_v3, %s321_s13  ;;  %138 = vrot.lane.b32.xlu0 %v121_v4, %s321_s13 }
  0x18   : > { %146 = vrot.lane.b32.xlu2 %v125_v5, %s321_s13 }
  0x1f   : > { %150 = vrot.lane.b32.xlu1 %v127_v6, %s321_s13  ;;  %148 = vrot.lane.b32.xlu0 %v126_v7, %s321_s13 }
  0x20   : > { %169 = vrot.lane.b32.xlu2 %v120_v1, %s322_s14 }
  0x27   : > { %173 = vrot.lane.b32.xlu1 %v122_v0, %s322_s14  ;;  %171 = vrot.lane.b32.xlu0 %v121_v4, %s322_s14 }
  0x28   : > { %175 = vrot.lane.b32.xlu2 %v123_v3, %s322_s14 }
  0x2f   : > { %179 = vrot.lane.b32.xlu1 %v125_v5, %s322_s14  ;;  %177 = vrot.lane.b32.xlu0 %v124_v2, %s322_s14 }
  0x30   : > { %181 = vrot.lane.b32.xlu2 %v126_v7, %s322_s14 }
  0x37   : > { %202 = vrot.lane.b32.xlu1 %v120_v1, %s323_s15  ;;  %183 = vrot.lane.b32.xlu0 %v127_v6, %s322_s14 }
  0x38   : > { %204 = vrot.lane.b32.xlu2 %v121_v4, %s323_s15 }
  0x3f   : > { %208 = vrot.lane.b32.xlu1 %v123_v3, %s323_s15  ;;  %206 = vrot.lane.b32.xlu0 %v122_v0, %s323_s15 }
  0x40   : > { %210 = vrot.lane.b32.xlu2 %v124_v2, %s323_s15 }
  0x47   : > { %214 = vrot.lane.b32.xlu1 %v126_v7, %s323_s15  ;;  %212 = vrot.lane.b32.xlu0 %v125_v5, %s323_s15 }
  0x48   : > { %216 = vrot.lane.b32.xlu2 %v127_v6, %s323_s15 }
  0x6a   : > { %v145_v8 = vpop.permute.xlu2 %144 }
  0x6b   : > { %165 = vst.msk [vmem:[%s355_s18 + $0x20] sm:$0xff] %vm160_vm0, %v145_v8 }
  0x72   : > { %v147_v9 = vpop.permute.xlu2 %146 }
  0x73   : > { %166 = vst.msk [vmem:[%s355_s18 + $0x28] sm:$0xff] %vm160_vm0, %v147_v9 }
  0x7a   : > { %v170_v10 = vpop.permute.xlu2 %169 }
  0x81   : > { %v141_v11 = vpop.permute.xlu1 %140  ;;  %v137_v12 = vpop.permute.xlu0 %136 }
  0x82   : > { %163 = vst.msk [vmem:[%s355_s18 + $0x10] sm:$0xff] %vm160_vm0, %v141_v11  ;;  %v176_v13 = vpop.permute.xlu2 %175 }
  0x83   : > { %161 = vst.msk [vmem:[%s355_s18] sm:$0xff] %vm160_vm0, %v137_v12 }
  0x84   : > { %194 = vst.msk [vmem:[%s355_s18] sm:$0xff] %vm193_vm1, %v170_v10 }
  0x89   : > { %v143_v14 = vpop.permute.xlu1 %142  ;;  %v139_v15 = vpop.permute.xlu0 %138 }
  0x8a   : > { %164 = vst.msk [vmem:[%s355_s18 + $0x18] sm:$0xff] %vm160_vm0, %v143_v14  ;;  %v182_v16 = vpop.permute.xlu2 %181 }
  0x8b   : > { %162 = vst.msk [vmem:[%s355_s18 + $0x8] sm:$0xff] %vm160_vm0, %v139_v15 }
  0x8c   : > { %197 = vst.msk [vmem:[%s355_s18 + $0x18] sm:$0xff] %vm193_vm1, %v176_v13 }
  0x91   : > { %v151_v17 = vpop.permute.xlu1 %150  ;;  %v149_v18 = vpop.permute.xlu0 %148 }
  0x92   : > { %168 = vst.msk [vmem:[%s355_s18 + $0x38] sm:$0xff] %vm160_vm0, %v151_v17  ;;  %v205_v19 = vpop.permute.xlu2 %204 }
  0x93   : > { %167 = vst.msk [vmem:[%s355_s18 + $0x30] sm:$0xff] %vm160_vm0, %v149_v18 }
  0x94   : > { %200 = vst.msk [vmem:[%s355_s18 + $0x30] sm:$0xff] %vm193_vm1, %v182_v16 }
  0x99   : > { %v174_v20 = vpop.permute.xlu1 %173  ;;  %v172_v21 = vpop.permute.xlu0 %171 }
  0x9a   : > { %196 = vst.msk [vmem:[%s355_s18 + $0x10] sm:$0xff] %vm193_vm1, %v174_v20  ;;  %v211_v22 = vpop.permute.xlu2 %210 }
  0x9b   : > { %195 = vst.msk [vmem:[%s355_s18 + $0x8] sm:$0xff] %vm193_vm1, %v172_v21 }
  0x9c   : > { %228 = vst.msk [vmem:[%s355_s18 + $0x8] sm:$0xff] %vm226_vm2, %v205_v19 }
  0xa1   : > { %v180_v23 = vpop.permute.xlu1 %179  ;;  %v178_v24 = vpop.permute.xlu0 %177 }
  0xa2   : > { %199 = vst.msk [vmem:[%s355_s18 + $0x28] sm:$0xff] %vm193_vm1, %v180_v23  ;;  %v217_v25 = vpop.permute.xlu2 %216 }
  0xa3   : > { %198 = vst.msk [vmem:[%s355_s18 + $0x20] sm:$0xff] %vm193_vm1, %v178_v24 }
  0xa4   : > { %231 = vst.msk [vmem:[%s355_s18 + $0x20] sm:$0xff] %vm226_vm2, %v211_v22 }
  0xa9   : > { %v203_v26 = vpop.permute.xlu1 %202  ;;  %v184_v27 = vpop.permute.xlu0 %183 }
  0xaa   : > { %227 = vst.msk [vmem:[%s355_s18] sm:$0xff] %vm226_vm2, %v203_v26 }
  0xab   : > { %201 = vst.msk [vmem:[%s355_s18 + $0x38] sm:$0xff] %vm193_vm1, %v184_v27 }
  0xac   : > { %234 = vst.msk [vmem:[%s355_s18 + $0x38] sm:$0xff] %vm226_vm2, %v217_v25 }
  0xb1   : > { %v209_v28 = vpop.permute.xlu1 %208  ;;  %v207_v29 = vpop.permute.xlu0 %206 }
  0xb2   : > { %230 = vst.msk [vmem:[%s355_s18 + $0x18] sm:$0xff] %vm226_vm2, %v209_v28 }
  0xb3   : > { %229 = vst.msk [vmem:[%s355_s18 + $0x10] sm:$0xff] %vm226_vm2, %v207_v29 }
  0xb9   : > { %v215_v30 = vpop.permute.xlu1 %214  ;;  %v213_v31 = vpop.permute.xlu0 %212 }
  0xba   : > { %233 = vst.msk [vmem:[%s355_s18 + $0x30] sm:$0xff] %vm226_vm2, %v215_v30 }
  0xbb   : > { %232 = vst.msk [vmem:[%s355_s18 + $0x28] sm:$0xff] %vm226_vm2, %v213_v31 }
  0xbc PF: > { %s11_s6 = sadd.s32 1, %s319_s6  }
  0xbd   : > { %p8_p4 = scmp.ge.s32.totalorder %s11_s6, 4  }
  0xbf   :  { %10 = sbr.rel (!%p8_p4) target bundleno = 1 (0x1), region = 54 }

</bundles_post_ra>
